<compile_context>
chip_gen: v5e
topology: v5e:2x2
jax: 0.10.0
libtpu: 0.0.40
codegen_flags: <defaults>
</compile_context>

<pallas_src>
import functools

import jax
import jax.numpy as jnp
from jax.experimental import pallas as pl
from jax.experimental.pallas import tpu as pltpu


_CHUNK = 256                      # lane-chunk width per inner step (2 f32 vregs wide)
_PTS_DIVISORS = (8192, 4096, 2048, 1024, 512, 256)
_MAX_FULL_PTS_BLOCK = 16384       # ~9 MiB double-buffered inputs at f32 -> fits scoped VMEM


def _round_up(x, m):
    return ((x + m - 1) // m) * m


# ---------------------------------------------------------------------------
# elementwise loss terms (sum form; all normalization folded into the wrapper)
# ---------------------------------------------------------------------------
def _elem_loss(diff, loss_type, beta):
    if loss_type == "l1":
        return jnp.abs(diff)
    elif loss_type == "smoothl1":
        ad = jnp.abs(diff)
        return jnp.where(ad < beta, (0.5 / beta) * (diff * diff), ad - 0.5 * beta)
    else:
        raise NotImplementedError(loss_type)


def _chunk_loss(pc_ref, vote_ref, start, width, t_b, rz_b, ry_b, sym, loss_type, beta):
    """Per-point loss for a lane chunk [start, start+width) of the current block."""
    f32 = jnp.float32
    sl = pl.ds(start, width)
    pc = [pc_ref[c, :, sl].astype(f32) for c in range(3)]
    pct = [pc[c] - t_b[c] for c in range(3)]          # PC - t, shared by both planes

    def axis_loss(r_b, vbase, loss):
        # canonical coordinate along this axis: (PC - t) . R[:, axis]
        cano = r_b[0] * pct[0] + r_b[1] * pct[1] + r_b[2] * pct[2]
        for c in range(3):
            v = vote_ref[vbase + c, :, sl].astype(f32)
            # diff = vote_c - (cano*R[c,axis] + t_c - pc_c) = (vote_c + pct_c) - cano*r_c
            diff = (v + pct[c]) - cano * r_b[c]
            loss = loss + _elem_loss(diff, loss_type, beta)
        return loss

    loss = axis_loss(rz_b, 0, jnp.zeros_like(pct[0]))   # z-plane vote
    if sym:
        loss = axis_loss(ry_b, 3, loss)                 # y-plane vote
    return loss


# ---------------------------------------------------------------------------
# Pallas kernel: one grid step = (b_tile batches) x (pts_block points),
# inner unrolled loop over 256-lane chunks, lane-dense partial-sum output.
# ---------------------------------------------------------------------------
def _vote_plane_kernel(pc_ref, vote_ref, par_ref, out_ref, *, sym, loss_type, beta,
                       b_tile, chunk_w, n_full, tail, pts_block, n_pts, need_p_mask):
    # pc_ref   : (3, b_tile, pts_block)      channel-major, points on lanes (native dtype)
    # vote_ref : (3 or 6, b_tile, pts_block) only the used channels are DMA'd
    # par_ref  : (P, b_tile, 1) f32          per-batch scalars [Rz(3), t(3), (Ry(3))]
    # out_ref  : (1, 1, b_tile, chunk_w)     lane-dense per-block partial loss sums
    f32 = jnp.float32

    def bcast_cols(width):
        # hoisted lane-broadcasts of the per-batch scalars (JAX does not CSE broadcasts)
        def bc(i):
            return jnp.broadcast_to(par_ref[i].astype(f32), (b_tile, width))
        rz = [bc(c) for c in range(3)]
        t = [bc(3 + c) for c in range(3)]
        ry = [bc(6 + c) for c in range(3)] if sym else None
        return t, rz, ry

    t_b, rz_b, ry_b = bcast_cols(chunk_w)

    acc = jnp.zeros((b_tile, chunk_w), f32)
    for ci in range(n_full):                       # static, fully unrolled chunk loop
        start = ci * chunk_w
        loss = _chunk_loss(pc_ref, vote_ref, start, chunk_w,
                           t_b, rz_b, ry_b, sym, loss_type, beta)
        if need_p_mask:
            # TODO(synk): only for huge & ragged n_pts; relies on Pallas boundary-block
            # padding semantics (out-of-range lanes are masked here).
            lane = jax.lax.broadcasted_iota(jnp.int32, (b_tile, chunk_w), 1)
            gidx = pl.program_id(1) * pts_block + start + lane
            loss = jnp.where(gidx < n_pts, loss, 0.0)
        acc = acc + loss

    if tail:
        # ragged point tail (width < chunk_w), aligned start, padded back to chunk width
        t_t, rz_t, ry_t = bcast_cols(tail)
        tloss = _chunk_loss(pc_ref, vote_ref, n_full * chunk_w, tail,
                            t_t, rz_t, ry_t, sym, loss_type, beta)
        acc = acc + jnp.concatenate(
            [tloss, jnp.zeros((b_tile, chunk_w - tail), f32)], axis=1)

    out_ref[...] = acc[None, None]


# ---------------------------------------------------------------------------
# Wrapper: fused relayout + pallas_call over (batch, point) blocks + one scale
# ---------------------------------------------------------------------------
@functools.partial(jax.jit, static_argnames=("sym_type", "loss_type", "beta"))
def vote_plane_loss(PC, PC_vote, gt_R, gt_t, *, sym_type, loss_type, beta=0.5):
    bs, n_pts, _ = PC.shape
    vd = PC_vote.shape[-1]
    sym = sym_type != 0
    c_used = 6 if sym else 3
    if vd < c_used:
        raise ValueError(
            f"Vote has {vd} channels but sym_type={sym_type} needs {c_used}")

    # Channel-major, points-on-lanes views.  Native dtype is kept (upcast in-kernel);
    # under this jit the transpose is a single fused relayout pass.  Unused y-plane
    # Vote channels are dropped before the relayout when sym_type == 0.
    pc_cm = jnp.transpose(PC, (2, 0, 1))                        # (3, bs, n_pts)
    vt_cm = jnp.transpose(PC_vote[..., :c_used], (2, 0, 1))     # (c_used, bs, n_pts)

    # Tiny per-batch scalar params: [Rz(3), t(3), (Ry(3))], f32.
    Rf = gt_R.astype(jnp.float32)
    Tf = gt_t.reshape(bs, 3).astype(jnp.float32)
    cols = [Rf[:, :, 2], Tf] + ([Rf[:, :, 1]] if sym else [])
    params = jnp.transpose(jnp.concatenate(cols, axis=1))[:, :, None]   # (P, bs, 1)
    P = params.shape[0]

    # ---- batch tiling ----------------------------------------------------
    if bs <= 8:
        b_tile, bs_pad = bs, bs
    else:
        b_tile, bs_pad = 8, _round_up(bs, 8)
    if bs_pad != bs:
        # <= 7 zero rows; zero params make padded rows contribute exactly 0 loss.
        pad = bs_pad - bs
        pc_cm = jnp.pad(pc_cm, ((0, 0), (0, pad), (0, 0)))
        vt_cm = jnp.pad(vt_cm, ((0, 0), (0, pad), (0, 0)))
        params = jnp.pad(params, ((0, 0), (0, pad), (0, 0)))
    nb = bs_pad // b_tile

    # ---- point tiling ----------------------------------------------------
    need_p_mask = False
    if n_pts <= _CHUNK:
        pts_block, chunk_w, n_full, tail = n_pts, n_pts, 1, 0
    else:
        chunk_w = _CHUNK
        divs = [d for d in _PTS_DIVISORS if n_pts % d == 0 and n_pts >= d]
        if divs:
            if nb >= 2:
                pts_block = divs[0]
            else:
                multi = [d for d in divs if n_pts // d >= 2]   # feed megacore when nb == 1
                pts_block = multi[0] if multi else divs[0]
            n_full, tail = pts_block // chunk_w, 0
        elif n_pts <= _MAX_FULL_PTS_BLOCK:
            pts_block = n_pts                                  # full-dim block, exact tail
            n_full, tail = n_pts // chunk_w, n_pts % chunk_w
        else:
            pts_block, n_full, tail = 2048, 2048 // chunk_w, 0
            need_p_mask = (n_pts % pts_block) != 0
    npb = pl.cdiv(n_pts, pts_block)

    kernel = functools.partial(
        _vote_plane_kernel, sym=sym, loss_type=loss_type, beta=beta,
        b_tile=b_tile, chunk_w=chunk_w, n_full=n_full, tail=tail,
        pts_block=pts_block, n_pts=n_pts, need_p_mask=need_p_mask)

    partials = pl.pallas_call(
        kernel,
        out_shape=jax.ShapeDtypeStruct((nb, npb, b_tile, chunk_w), jnp.float32),
        grid_spec=pltpu.PrefetchScalarGridSpec(
            num_scalar_prefetch=0,
            grid=(nb, npb),
            in_specs=[
                pl.BlockSpec((3, b_tile, pts_block), lambda gb, gp: (0, gb, gp)),
                pl.BlockSpec((c_used, b_tile, pts_block), lambda gb, gp: (0, gb, gp)),
                pl.BlockSpec((P, b_tile, 1), lambda gb, gp: (0, gb, 0)),
            ],
            out_specs=pl.BlockSpec((1, 1, b_tile, chunk_w),
                                   lambda gb, gp: (gb, gp, 0, 0)),
        ),
        compiler_params=pltpu.CompilerParams(
            dimension_semantics=("parallel", "parallel")),
    )(pc_cm, vt_cm, params)

    total = jnp.sum(partials)
    # fold: per-axis mean over (3*n_pts), /bs, and /2 when symmetric
    denom = 3.0 * float(n_pts) * float(bs) * (2.0 if sym else 1.0)
    return total / denom


# ---------------------------------------------------------------------------
# Module-like wrapper mirroring Vote_plane_loss.forward
# ---------------------------------------------------------------------------
class Cfg:
    def __init__(self, sym_type, pose_loss_type, vote_plane_w, vote_plane_con_w):
        self.sym_type = sym_type
        self.pose_loss_type = pose_loss_type
        self.vote_plane_w = vote_plane_w
        self.vote_plane_con_w = vote_plane_con_w


class VotePlaneLossPallas:
    def __init__(self, cfg):
        if cfg.pose_loss_type not in ("l1", "smoothl1"):
            raise NotImplementedError
        self.cfg = cfg
        self.sym_type = cfg.sym_type

    def __call__(self, namelist, pred_list, gt_list):
        loss_list = {}
        if "Vote_plane" in namelist:
            loss_list["Vote_plane"] = self.cfg.vote_plane_w * vote_plane_loss(
                gt_list["Points"], pred_list["Vote"], gt_list["R"], gt_list["T"],
                sym_type=self.cfg.sym_type, loss_type=self.cfg.pose_loss_type)
        else:
            loss_list["Vote_plane"] = 0.0
        if "Vote_plane_con" in namelist and self.cfg.vote_plane_con_w > 0:
            # TODO(synk): reference vote_plane_con_loss reads undefined `self.vote_type`
            # (bug in the source module); unreachable when vote_plane_con_w == 0.
            raise NotImplementedError
        else:
            loss_list["Vote_plane_con"] = 0.0
        return loss_list


# ---------------------------------------------------------------------------
# Pure-JAX reference (mirrors the torch per-batch loop)
# ---------------------------------------------------------------------------
def _ref_vote_plane(PC, Vote, R, t, sym_type, loss_type, beta=0.5):
    bs = PC.shape[0]

    def per_batch(pc, v, r, tt):
        pc_c = pc - tt[None, :]

        def axis_loss(k, lo, hi):
            r_k = r[:, k]
            cano = pc_c @ r_k
            gt = cano[:, None] * r_k[None, :] + tt[None, :] - pc
            d = v[:, lo:hi] - gt
            return jnp.mean(_elem_loss(d, loss_type, beta))

        l = axis_loss(2, 0, 3)
        if sym_type != 0:
            l = l + axis_loss(1, 3, 6)
        return l

    total = sum(per_batch(PC[i], Vote[i], R[i], t[i].reshape(3)) for i in range(bs))
    return total / 2.0 / bs if sym_type != 0 else total / bs


def _close(a, b, tol=1e-3):
    return abs(float(a) - float(b)) <= tol * max(1.0, abs(float(b)))


# ---------------------------------------------------------------------------
if __name__ == "__main__":
    key = jax.random.PRNGKey(0)

    # (a) small shapes through the module wrapper (sym, smoothl1)
    bs, n_pts = 2, 16
    k1, k2, k3, k4 = jax.random.split(key, 4)
    PC = jax.random.normal(k1, (bs, n_pts, 3), dtype=jnp.float32)
    Vote = jax.random.normal(k2, (bs, n_pts, 6), dtype=jnp.float32)
    R = jax.random.normal(k3, (bs, 3, 3), dtype=jnp.float32)
    T = jax.random.normal(k4, (bs, 3), dtype=jnp.float32)

    cfg = Cfg(sym_type=1, pose_loss_type="smoothl1", vote_plane_w=2.0, vote_plane_con_w=0.0)
    module = VotePlaneLossPallas(cfg)
    out = module(["Vote_plane"], {"Vote": Vote}, {"Points": PC, "R": R, "T": T})
    val = jax.block_until_ready(out["Vote_plane"])
    ref = cfg.vote_plane_w * _ref_vote_plane(PC, Vote, R, T, 1, "smoothl1")
    assert out["Vote_plane_con"] == 0.0
    assert _close(val, ref), (float(val), float(ref))

    # (b) multi batch-block grid (bs multiple of 8), sym + smoothl1
    bs2, n2 = 40, 128
    k5, k6, k7, k8 = jax.random.split(jax.random.PRNGKey(1), 4)
    PC2 = jax.random.normal(k5, (bs2, n2, 3), dtype=jnp.float32)
    Vote2 = jax.random.normal(k6, (bs2, n2, 6), dtype=jnp.float32)
    R2 = jax.random.normal(k7, (bs2, 3, 3), dtype=jnp.float32)
    T2 = jax.random.normal(k8, (bs2, 3), dtype=jnp.float32)
    val2 = jax.block_until_ready(
        vote_plane_loss(PC2, Vote2, R2, T2, sym_type=1, loss_type="smoothl1"))
    ref2 = _ref_vote_plane(PC2, Vote2, R2, T2, 1, "smoothl1")
    assert _close(val2, ref2), (float(val2), float(ref2))

    # (c) ragged batch (zero-pad path) + ragged point tail chunk
    bs3, n3 = 10, 300
    k9, k10, k11, k12 = jax.random.split(jax.random.PRNGKey(2), 4)
    PC3 = jax.random.normal(k9, (bs3, n3, 3), dtype=jnp.float32)
    Vote3 = jax.random.normal(k10, (bs3, n3, 6), dtype=jnp.float32)
    R3 = jax.random.normal(k11, (bs3, 3, 3), dtype=jnp.float32)
    T3 = jax.random.normal(k12, (bs3, 3), dtype=jnp.float32)
    val3 = jax.block_until_ready(
        vote_plane_loss(PC3, Vote3, R3, T3, sym_type=1, loss_type="smoothl1"))
    ref3 = _ref_vote_plane(PC3, Vote3, R3, T3, 1, "smoothl1")
    assert _close(val3, ref3), (float(val3), float(ref3))

    # (d) non-symmetric / pure-L1: unused Vote channels skipped, point axis split + chunked
    bs4, n4 = 8, 1024
    k13, k14, k15, k16 = jax.random.split(jax.random.PRNGKey(3), 4)
    PC4 = jax.random.normal(k13, (bs4, n4, 3), dtype=jnp.float32)
    Vote4 = jax.random.normal(k14, (bs4, n4, 6), dtype=jnp.float32)
    R4 = jax.random.normal(k15, (bs4, 3, 3), dtype=jnp.float32)
    T4 = jax.random.normal(k16, (bs4, 3), dtype=jnp.float32)
    val4 = jax.block_until_ready(
        vote_plane_loss(PC4, Vote4, R4, T4, sym_type=0, loss_type="l1"))
    ref4 = _ref_vote_plane(PC4, Vote4, R4, T4, 0, "l1")
    assert _close(val4, ref4), (float(val4), float(ref4))

    print("KERNEL_OK")
</pallas_src>

<mosaic_0001>
module attributes {stable_mosaic.version = 11 : i64} {
  func.func @_vote_plane_kernel(%arg0: i32, %arg1: i32, %arg2: memref<3x2x16xf32, #tpu.memory_space<vmem>>, %arg3: memref<6x2x16xf32, #tpu.memory_space<vmem>>, %arg4: memref<9x2x1xf32, #tpu.memory_space<vmem>>, %arg5: memref<1x1x2x16xf32, #tpu.memory_space<vmem>>) attributes {dimension_semantics = [#tpu.dimension_semantics<parallel>, #tpu.dimension_semantics<parallel>], iteration_bounds = array<i64: 1, 1>, scalar_prefetch = 0 : i64, scratch_operands = 0 : i64, tpu.core_type = #tpu.core_type<tc>, window_params = [{transform_indices = @transform_0, window_bounds = array<i64: 3, 2, 16>}, {transform_indices = @transform_1, window_bounds = array<i64: 6, 2, 16>}, {transform_indices = @transform_2, window_bounds = array<i64: 9, 2, 1>}, {transform_indices = @transform_3, window_bounds = array<i64: 1, 1, 2, 16>}]} {
    %c0 = arith.constant 0 : index
    %c0_0 = arith.constant 0 : index
    %c0_1 = arith.constant 0 : index
    %0 = vector.load %arg4[%c0, %c0_0, %c0_1] : memref<9x2x1xf32, #tpu.memory_space<vmem>>, vector<1x2x1xf32>
    %1 = vector.shape_cast %0 : vector<1x2x1xf32> to vector<2x1xf32>
    %2 = vector.shape_cast %1 : vector<2x1xf32> to vector<2x1xf32>
    %3 = vector.broadcast %2 : vector<2x1xf32> to vector<2x16xf32>
    %c1 = arith.constant 1 : index
    %c0_2 = arith.constant 0 : index
    %c0_3 = arith.constant 0 : index
    %4 = vector.load %arg4[%c1, %c0_2, %c0_3] : memref<9x2x1xf32, #tpu.memory_space<vmem>>, vector<1x2x1xf32>
    %5 = vector.shape_cast %4 : vector<1x2x1xf32> to vector<2x1xf32>
    %6 = vector.shape_cast %5 : vector<2x1xf32> to vector<2x1xf32>
    %7 = vector.broadcast %6 : vector<2x1xf32> to vector<2x16xf32>
    %c2 = arith.constant 2 : index
    %c0_4 = arith.constant 0 : index
    %c0_5 = arith.constant 0 : index
    %8 = vector.load %arg4[%c2, %c0_4, %c0_5] : memref<9x2x1xf32, #tpu.memory_space<vmem>>, vector<1x2x1xf32>
    %9 = vector.shape_cast %8 : vector<1x2x1xf32> to vector<2x1xf32>
    %10 = vector.shape_cast %9 : vector<2x1xf32> to vector<2x1xf32>
    %11 = vector.broadcast %10 : vector<2x1xf32> to vector<2x16xf32>
    %c3 = arith.constant 3 : index
    %c0_6 = arith.constant 0 : index
    %c0_7 = arith.constant 0 : index
    %12 = vector.load %arg4[%c3, %c0_6, %c0_7] : memref<9x2x1xf32, #tpu.memory_space<vmem>>, vector<1x2x1xf32>
    %13 = vector.shape_cast %12 : vector<1x2x1xf32> to vector<2x1xf32>
    %14 = vector.shape_cast %13 : vector<2x1xf32> to vector<2x1xf32>
    %15 = vector.broadcast %14 : vector<2x1xf32> to vector<2x16xf32>
    %c4 = arith.constant 4 : index
    %c0_8 = arith.constant 0 : index
    %c0_9 = arith.constant 0 : index
    %16 = vector.load %arg4[%c4, %c0_8, %c0_9] : memref<9x2x1xf32, #tpu.memory_space<vmem>>, vector<1x2x1xf32>
    %17 = vector.shape_cast %16 : vector<1x2x1xf32> to vector<2x1xf32>
    %18 = vector.shape_cast %17 : vector<2x1xf32> to vector<2x1xf32>
    %19 = vector.broadcast %18 : vector<2x1xf32> to vector<2x16xf32>
    %c5 = arith.constant 5 : index
    %c0_10 = arith.constant 0 : index
    %c0_11 = arith.constant 0 : index
    %20 = vector.load %arg4[%c5, %c0_10, %c0_11] : memref<9x2x1xf32, #tpu.memory_space<vmem>>, vector<1x2x1xf32>
    %21 = vector.shape_cast %20 : vector<1x2x1xf32> to vector<2x1xf32>
    %22 = vector.shape_cast %21 : vector<2x1xf32> to vector<2x1xf32>
    %23 = vector.broadcast %22 : vector<2x1xf32> to vector<2x16xf32>
    %c6 = arith.constant 6 : index
    %c0_12 = arith.constant 0 : index
    %c0_13 = arith.constant 0 : index
    %24 = vector.load %arg4[%c6, %c0_12, %c0_13] : memref<9x2x1xf32, #tpu.memory_space<vmem>>, vector<1x2x1xf32>
    %25 = vector.shape_cast %24 : vector<1x2x1xf32> to vector<2x1xf32>
    %26 = vector.shape_cast %25 : vector<2x1xf32> to vector<2x1xf32>
    %27 = vector.broadcast %26 : vector<2x1xf32> to vector<2x16xf32>
    %c7 = arith.constant 7 : index
    %c0_14 = arith.constant 0 : index
    %c0_15 = arith.constant 0 : index
    %28 = vector.load %arg4[%c7, %c0_14, %c0_15] : memref<9x2x1xf32, #tpu.memory_space<vmem>>, vector<1x2x1xf32>
    %29 = vector.shape_cast %28 : vector<1x2x1xf32> to vector<2x1xf32>
    %30 = vector.shape_cast %29 : vector<2x1xf32> to vector<2x1xf32>
    %31 = vector.broadcast %30 : vector<2x1xf32> to vector<2x16xf32>
    %c8 = arith.constant 8 : index
    %c0_16 = arith.constant 0 : index
    %c0_17 = arith.constant 0 : index
    %32 = vector.load %arg4[%c8, %c0_16, %c0_17] : memref<9x2x1xf32, #tpu.memory_space<vmem>>, vector<1x2x1xf32>
    %33 = vector.shape_cast %32 : vector<1x2x1xf32> to vector<2x1xf32>
    %34 = vector.shape_cast %33 : vector<2x1xf32> to vector<2x1xf32>
    %35 = vector.broadcast %34 : vector<2x1xf32> to vector<2x16xf32>
    %cst = arith.constant 0.000000e+00 : f32
    %36 = vector.broadcast %cst : f32 to vector<2x16xf32>
    %c0_18 = arith.constant 0 : index
    %c0_19 = arith.constant 0 : index
    %c0_20 = arith.constant 0 : index
    %37 = vector.load %arg2[%c0_18, %c0_19, %c0_20] : memref<3x2x16xf32, #tpu.memory_space<vmem>>, vector<1x2x16xf32>
    %38 = vector.shape_cast %37 : vector<1x2x16xf32> to vector<2x16xf32>
    %c1_21 = arith.constant 1 : index
    %c0_22 = arith.constant 0 : index
    %c0_23 = arith.constant 0 : index
    %39 = vector.load %arg2[%c1_21, %c0_22, %c0_23] : memref<3x2x16xf32, #tpu.memory_space<vmem>>, vector<1x2x16xf32>
    %40 = vector.shape_cast %39 : vector<1x2x16xf32> to vector<2x16xf32>
    %c2_24 = arith.constant 2 : index
    %c0_25 = arith.constant 0 : index
    %c0_26 = arith.constant 0 : index
    %41 = vector.load %arg2[%c2_24, %c0_25, %c0_26] : memref<3x2x16xf32, #tpu.memory_space<vmem>>, vector<1x2x16xf32>
    %42 = vector.shape_cast %41 : vector<1x2x16xf32> to vector<2x16xf32>
    %43 = arith.subf %38, %15 : vector<2x16xf32>
    %44 = arith.subf %40, %19 : vector<2x16xf32>
    %45 = arith.subf %42, %23 : vector<2x16xf32>
    %cst_27 = arith.constant 0.000000e+00 : f32
    %46 = vector.broadcast %cst_27 : f32 to vector<2x16xf32>
    %47 = arith.mulf %3, %43 : vector<2x16xf32>
    %48 = arith.mulf %7, %44 : vector<2x16xf32>
    %49 = arith.addf %47, %48 : vector<2x16xf32>
    %50 = arith.mulf %11, %45 : vector<2x16xf32>
    %51 = arith.addf %49, %50 : vector<2x16xf32>
    %c0_28 = arith.constant 0 : index
    %c0_29 = arith.constant 0 : index
    %c0_30 = arith.constant 0 : index
    %52 = vector.load %arg3[%c0_28, %c0_29, %c0_30] : memref<6x2x16xf32, #tpu.memory_space<vmem>>, vector<1x2x16xf32>
    %53 = vector.shape_cast %52 : vector<1x2x16xf32> to vector<2x16xf32>
    %54 = arith.addf %53, %43 : vector<2x16xf32>
    %55 = arith.mulf %51, %3 : vector<2x16xf32>
    %56 = arith.subf %54, %55 : vector<2x16xf32>
    %57 = math.absf %56 : vector<2x16xf32>
    %cst_31 = arith.constant 5.000000e-01 : f32
    %58 = vector.broadcast %cst_31 : f32 to vector<2x16xf32>
    %59 = arith.cmpf olt, %57, %58 : vector<2x16xf32>
    %60 = arith.mulf %56, %56 : vector<2x16xf32>
    %cst_32 = arith.constant 1.000000e+00 : f32
    %61 = vector.broadcast %cst_32 : f32 to vector<2x16xf32>
    %62 = arith.mulf %61, %60 : vector<2x16xf32>
    %cst_33 = arith.constant 2.500000e-01 : f32
    %63 = vector.broadcast %cst_33 : f32 to vector<2x16xf32>
    %64 = arith.subf %57, %63 : vector<2x16xf32>
    %65 = arith.select %59, %62, %64 : vector<2x16xi1>, vector<2x16xf32>
    %66 = arith.addf %46, %65 : vector<2x16xf32>
    %c1_34 = arith.constant 1 : index
    %c0_35 = arith.constant 0 : index
    %c0_36 = arith.constant 0 : index
    %67 = vector.load %arg3[%c1_34, %c0_35, %c0_36] : memref<6x2x16xf32, #tpu.memory_space<vmem>>, vector<1x2x16xf32>
    %68 = vector.shape_cast %67 : vector<1x2x16xf32> to vector<2x16xf32>
    %69 = arith.addf %68, %44 : vector<2x16xf32>
    %70 = arith.mulf %51, %7 : vector<2x16xf32>
    %71 = arith.subf %69, %70 : vector<2x16xf32>
    %72 = math.absf %71 : vector<2x16xf32>
    %cst_37 = arith.constant 5.000000e-01 : f32
    %73 = vector.broadcast %cst_37 : f32 to vector<2x16xf32>
    %74 = arith.cmpf olt, %72, %73 : vector<2x16xf32>
    %75 = arith.mulf %71, %71 : vector<2x16xf32>
    %cst_38 = arith.constant 1.000000e+00 : f32
    %76 = vector.broadcast %cst_38 : f32 to vector<2x16xf32>
    %77 = arith.mulf %76, %75 : vector<2x16xf32>
    %cst_39 = arith.constant 2.500000e-01 : f32
    %78 = vector.broadcast %cst_39 : f32 to vector<2x16xf32>
    %79 = arith.subf %72, %78 : vector<2x16xf32>
    %80 = arith.select %74, %77, %79 : vector<2x16xi1>, vector<2x16xf32>
    %81 = arith.addf %66, %80 : vector<2x16xf32>
    %c2_40 = arith.constant 2 : index
    %c0_41 = arith.constant 0 : index
    %c0_42 = arith.constant 0 : index
    %82 = vector.load %arg3[%c2_40, %c0_41, %c0_42] : memref<6x2x16xf32, #tpu.memory_space<vmem>>, vector<1x2x16xf32>
    %83 = vector.shape_cast %82 : vector<1x2x16xf32> to vector<2x16xf32>
    %84 = arith.addf %83, %45 : vector<2x16xf32>
    %85 = arith.mulf %51, %11 : vector<2x16xf32>
    %86 = arith.subf %84, %85 : vector<2x16xf32>
    %87 = math.absf %86 : vector<2x16xf32>
    %cst_43 = arith.constant 5.000000e-01 : f32
    %88 = vector.broadcast %cst_43 : f32 to vector<2x16xf32>
    %89 = arith.cmpf olt, %87, %88 : vector<2x16xf32>
    %90 = arith.mulf %86, %86 : vector<2x16xf32>
    %cst_44 = arith.constant 1.000000e+00 : f32
    %91 = vector.broadcast %cst_44 : f32 to vector<2x16xf32>
    %92 = arith.mulf %91, %90 : vector<2x16xf32>
    %cst_45 = arith.constant 2.500000e-01 : f32
    %93 = vector.broadcast %cst_45 : f32 to vector<2x16xf32>
    %94 = arith.subf %87, %93 : vector<2x16xf32>
    %95 = arith.select %89, %92, %94 : vector<2x16xi1>, vector<2x16xf32>
    %96 = arith.addf %81, %95 : vector<2x16xf32>
    %97 = arith.mulf %27, %43 : vector<2x16xf32>
    %98 = arith.mulf %31, %44 : vector<2x16xf32>
    %99 = arith.addf %97, %98 : vector<2x16xf32>
    %100 = arith.mulf %35, %45 : vector<2x16xf32>
    %101 = arith.addf %99, %100 : vector<2x16xf32>
    %c3_46 = arith.constant 3 : index
    %c0_47 = arith.constant 0 : index
    %c0_48 = arith.constant 0 : index
    %102 = vector.load %arg3[%c3_46, %c0_47, %c0_48] : memref<6x2x16xf32, #tpu.memory_space<vmem>>, vector<1x2x16xf32>
    %103 = vector.shape_cast %102 : vector<1x2x16xf32> to vector<2x16xf32>
    %104 = arith.addf %103, %43 : vector<2x16xf32>
    %105 = arith.mulf %101, %27 : vector<2x16xf32>
    %106 = arith.subf %104, %105 : vector<2x16xf32>
    %107 = math.absf %106 : vector<2x16xf32>
    %cst_49 = arith.constant 5.000000e-01 : f32
    %108 = vector.broadcast %cst_49 : f32 to vector<2x16xf32>
    %109 = arith.cmpf olt, %107, %108 : vector<2x16xf32>
    %110 = arith.mulf %106, %106 : vector<2x16xf32>
    %cst_50 = arith.constant 1.000000e+00 : f32
    %111 = vector.broadcast %cst_50 : f32 to vector<2x16xf32>
    %112 = arith.mulf %111, %110 : vector<2x16xf32>
    %cst_51 = arith.constant 2.500000e-01 : f32
    %113 = vector.broadcast %cst_51 : f32 to vector<2x16xf32>
    %114 = arith.subf %107, %113 : vector<2x16xf32>
    %115 = arith.select %109, %112, %114 : vector<2x16xi1>, vector<2x16xf32>
    %116 = arith.addf %96, %115 : vector<2x16xf32>
    %c4_52 = arith.constant 4 : index
    %c0_53 = arith.constant 0 : index
    %c0_54 = arith.constant 0 : index
    %117 = vector.load %arg3[%c4_52, %c0_53, %c0_54] : memref<6x2x16xf32, #tpu.memory_space<vmem>>, vector<1x2x16xf32>
    %118 = vector.shape_cast %117 : vector<1x2x16xf32> to vector<2x16xf32>
    %119 = arith.addf %118, %44 : vector<2x16xf32>
    %120 = arith.mulf %101, %31 : vector<2x16xf32>
    %121 = arith.subf %119, %120 : vector<2x16xf32>
    %122 = math.absf %121 : vector<2x16xf32>
    %cst_55 = arith.constant 5.000000e-01 : f32
    %123 = vector.broadcast %cst_55 : f32 to vector<2x16xf32>
    %124 = arith.cmpf olt, %122, %123 : vector<2x16xf32>
    %125 = arith.mulf %121, %121 : vector<2x16xf32>
    %cst_56 = arith.constant 1.000000e+00 : f32
    %126 = vector.broadcast %cst_56 : f32 to vector<2x16xf32>
    %127 = arith.mulf %126, %125 : vector<2x16xf32>
    %cst_57 = arith.constant 2.500000e-01 : f32
    %128 = vector.broadcast %cst_57 : f32 to vector<2x16xf32>
    %129 = arith.subf %122, %128 : vector<2x16xf32>
    %130 = arith.select %124, %127, %129 : vector<2x16xi1>, vector<2x16xf32>
    %131 = arith.addf %116, %130 : vector<2x16xf32>
    %c5_58 = arith.constant 5 : index
    %c0_59 = arith.constant 0 : index
    %c0_60 = arith.constant 0 : index
    %132 = vector.load %arg3[%c5_58, %c0_59, %c0_60] : memref<6x2x16xf32, #tpu.memory_space<vmem>>, vector<1x2x16xf32>
    %133 = vector.shape_cast %132 : vector<1x2x16xf32> to vector<2x16xf32>
    %134 = arith.addf %133, %45 : vector<2x16xf32>
    %135 = arith.mulf %101, %35 : vector<2x16xf32>
    %136 = arith.subf %134, %135 : vector<2x16xf32>
    %137 = math.absf %136 : vector<2x16xf32>
    %cst_61 = arith.constant 5.000000e-01 : f32
    %138 = vector.broadcast %cst_61 : f32 to vector<2x16xf32>
    %139 = arith.cmpf olt, %137, %138 : vector<2x16xf32>
    %140 = arith.mulf %136, %136 : vector<2x16xf32>
    %cst_62 = arith.constant 1.000000e+00 : f32
    %141 = vector.broadcast %cst_62 : f32 to vector<2x16xf32>
    %142 = arith.mulf %141, %140 : vector<2x16xf32>
    %cst_63 = arith.constant 2.500000e-01 : f32
    %143 = vector.broadcast %cst_63 : f32 to vector<2x16xf32>
    %144 = arith.subf %137, %143 : vector<2x16xf32>
    %145 = arith.select %139, %142, %144 : vector<2x16xi1>, vector<2x16xf32>
    %146 = arith.addf %131, %145 : vector<2x16xf32>
    %147 = arith.addf %36, %146 : vector<2x16xf32>
    %148 = vector.shape_cast %147 : vector<2x16xf32> to vector<1x1x2x16xf32>
    %c0_64 = arith.constant 0 : index
    %c0_65 = arith.constant 0 : index
    %c0_66 = arith.constant 0 : index
    %c0_67 = arith.constant 0 : index
    %149 = vector.load %arg5[%c0_64, %c0_65, %c0_66, %c0_67] : memref<1x1x2x16xf32, #tpu.memory_space<vmem>>, vector<1x1x2x16xf32>
    tpu.vector_store %arg5[%c0_64, %c0_65, %c0_66, %c0_67], %148 {strides = array<i32>} : memref<1x1x2x16xf32, #tpu.memory_space<vmem>>, vector<1x1x2x16xf32>,
    return
  }
  func.func @transform_0(%arg0: i32, %arg1: i32) -> (i32, i32, i32) {
    %c0_i32 = arith.constant 0 : i32
    %c0_i32_0 = arith.constant 0 : i32
    return %c0_i32, %arg0, %arg1 : i32, i32, i32
  }
  func.func @transform_1(%arg0: i32, %arg1: i32) -> (i32, i32, i32) {
    %c0_i32 = arith.constant 0 : i32
    %c0_i32_0 = arith.constant 0 : i32
    return %c0_i32, %arg0, %arg1 : i32, i32, i32
  }
  func.func @transform_2(%arg0: i32, %arg1: i32) -> (i32, i32, i32) {
    %c0_i32 = arith.constant 0 : i32
    %c0_i32_0 = arith.constant 0 : i32
    %c0_i32_1 = arith.constant 0 : i32
    return %c0_i32, %arg0, %c0_i32_0 : i32, i32, i32
  }
  func.func @transform_3(%arg0: i32, %arg1: i32) -> (i32, i32, i32, i32) {
    %c0_i32 = arith.constant 0 : i32
    %c0_i32_0 = arith.constant 0 : i32
    %c0_i32_1 = arith.constant 0 : i32
    return %arg0, %arg1, %c0_i32, %c0_i32_0 : i32, i32, i32, i32
  }
}

</mosaic_0001>

<bundles_post_ra>
// kernel: vote_plane_loss.1
= control target key start
LH: loop header
LB: loop body
LE: loop exit
PB: predicated region body
PF: predicated region fallthrough
CT: control target
= control target key end

     0   :  { %v191_v0 = vmov 0   ;;  %vm160_vm6 = vcmask 123904   ;;  %s269_s2 = inlined_call_operand.vmem [shape: f32[9,2,1], index: 2, kind: input, shape index: {}]   ;;  %s270_s0 = inlined_call_operand.vmem [shape: f32[3,2,16], index: 0, kind: input, shape index: {}]   ;;  %s271_s1 = inlined_call_operand.vmem [shape: f32[6,2,16], index: 1, kind: input, shape index: {}]   ;;  %s272_s3 = inlined_call_operand.vmem [shape: f32[1,1,2,16], index: 3, kind: output, shape index: {}]  }
   0x1   :  { %189 = vset.pattern.permute.xlu1 %v191_v0  ;;  %188 = vset.pattern.permute.xlu0 %v191_v0  ;;  %v168_v1 = vld [vmem:[%s269_s2 + $0x6] sm:$0x3]  ;;  %v14_v2 = vld [vmem:[%s269_s2] sm:$0x3]  ;;  %v170_v3 = vld [vmem:[%s269_s2 + $0xa] sm:$0x3] }
   0x2   :  { %38 = vperm.xlu0 %188, %v168_v1   ;;  %17 = vperm.xlu1 %189, %v14_v2   ;;  %v169_v4 = vld [vmem:[%s269_s2 + $0x8] sm:$0x3]  ;;  %v166_v5 = vld [vmem:[%s269_s2 + $0x2] sm:$0x3]  ;;  %v167_v6 = vld [vmem:[%s269_s2 + $0x4] sm:$0x3] }
   0x3   :  { %190 = vset.pattern.permute.xlu2 %v191_v0  ;;  %v171_v7 = vld [vmem:[%s269_s2 + $0xc] sm:$0x3]  ;;  %v172_v8 = vld [vmem:[%s269_s2 + $0xe] sm:$0x3]  ;;  %v173_v9 = vld [vmem:[%s269_s2 + $0x10] sm:$0x3] }
   0x4   :  { %52 = vperm.xlu2 %190, %v170_v3   ;;  %v76_v13 = vld [vmem:[%s270_s0] sm:$0x3]  ;;  %v175_v14 = vld [vmem:[%s270_s0 + $0x4] sm:$0x3]  ;;  %v174_v15 = vld [vmem:[%s270_s0 + $0x2] sm:$0x3] }
   0x5   :  { %v179_v24 = vld [vmem:[%s271_s1 + $0x4] sm:$0x3]  ;;  %v89_v26 = vld [vmem:[%s271_s1] sm:$0x3]  ;;  %v177_v28 = vld [vmem:[%s271_s1 + $0x2] sm:$0x3] }
   0x6   :  { %v185_v40 = vld [vmem:[%s271_s1 + $0xa] sm:$0x3]  ;;  %v181_v45 = vld [vmem:[%s271_s1 + $0x6] sm:$0x3]  ;;  %v183_v51 = vld [vmem:[%s271_s1 + $0x8] sm:$0x3] }
   0xa   :  { %45 = vperm.xlu0 %188, %v169_v4   ;;  %24 = vperm.xlu1 %189, %v166_v5  }
   0xc   :  { %31 = vperm.xlu2 %190, %v167_v6  }
  0x12   :  { %59 = vperm.xlu0 %188, %v171_v7   ;;  %66 = vperm.xlu1 %189, %v172_v8  }
  0x14   :  { %73 = vperm.xlu2 %190, %v173_v9  }
  0x5e   :  { %v53_v10 = vpop.permute.xlu2 %52 }
  0x5f   :  { %v83_v20 = vsub.f32 %v175_v14, %v53_v10 }
  0x61   :  { %v112_v30 = vadd.f32 %v179_v24, %v83_v20  ;;  %v150_v48 = vadd.f32 %v185_v40, %v83_v20 }
  0x66   :  { %v32_v16 = vpop.permute.xlu2 %31 }
  0x67   :  { %v87_v25 = vmul.f32 %v83_v20, %v32_v16 }
  0x6e   :  { %v74_v35 = vpop.permute.xlu2 %73 }
  0x6f   :  { %v124_v46 = vmul.f32 %v83_v20, %v74_v35 }
  0x74   :  { %v39_v11 = vpop.permute.xlu0 %38  ;;  %v18_v12 = vpop.permute.xlu1 %17 }
  0x75   :  { %v81_v17 = vsub.f32 %v76_v13, %v39_v11 }
  0x77   :  { %v84_v22 = vmul.f32 %v81_v17, %v18_v12  ;;  %v90_v31 = vadd.f32 %v89_v26, %v81_v17  ;;  %v128_v58 = vadd.f32 %v181_v45, %v81_v17 }
  0x7c   :  { %v46_v18 = vpop.permute.xlu0 %45  ;;  %v25_v19 = vpop.permute.xlu1 %24 }
  0x7d   :  { %v82_v21 = vsub.f32 %v174_v15, %v46_v18 }
  0x7f   :  { %v85_v23 = vmul.f32 %v82_v21, %v25_v19  ;;  %v101_v32 = vadd.f32 %v177_v28, %v82_v21  ;;  %v139_v60 = vadd.f32 %v183_v51, %v82_v21 }
  0x81   :  { %v86_v27 = vadd.f32 %v85_v23, %v84_v22 }
  0x83   :  { %v88_v29 = vadd.f32 %v87_v25, %v86_v27 }
  0x84   :  { %v60_v33 = vpop.permute.xlu0 %59  ;;  %v67_v34 = vpop.permute.xlu1 %66 }
  0x85   :  { %v91_v36 = vmul.f32 %v88_v29, %v18_v12  ;;  %v102_v37 = vmul.f32 %v88_v29, %v25_v19  ;;  %v113_v38 = vmul.f32 %v88_v29, %v32_v16  ;;  %v121_v39 = vmul.f32 %v81_v17, %v60_v33 }
  0x86   :  { %v122_v41 = vmul.f32 %v82_v21, %v67_v34 }
  0x87   :  { %v92_v42 = vsub.f32 %v90_v31, %v91_v36  ;;  %v103_v43 = vsub.f32 %v101_v32, %v102_v37  ;;  %v114_v44 = vsub.f32 %v112_v30, %v113_v38 }
  0x88   :  { %v123_v47 = vadd.f32 %v122_v41, %v121_v39 }
  0x89   :  { %v93_v49 = vand.u32 2147483647, %v92_v42  ;;  %v104_v50 = vand.u32 2147483647, %v103_v43  ;;  %v95_v52 = vmul.f32 %v92_v42, %v92_v42  ;;  %v106_v53 = vmul.f32 %v103_v43, %v103_v43 }
  0x8a   :  { %v115_v54 = vand.u32 2147483647, %v114_v44  ;;  %v125_v55 = vadd.f32 %v124_v46, %v123_v47  ;;  %v117_v5 = vmul.f32 %v114_v44, %v114_v44 }
  0x8b   :  { %vm94_vm0 = vcmp.lt.f32.partialorder %v93_v49, 0.5  ;;  %v176_v56 = vadd.f32 -0.25, %v93_v49  ;;  %vm105_vm1 = vcmp.lt.f32.partialorder %v104_v50, 0.5  ;;  %v178_v57 = vadd.f32 -0.25, %v104_v50 }
  0x8c   :  { %v129_v59 = vmul.f32 %v125_v55, %v60_v33  ;;  %v140_v61 = vmul.f32 %v125_v55, %v67_v34  ;;  %v180_v0 = vadd.f32 -0.25, %v115_v54  ;;  %v151_v1 = vmul.f32 %v125_v55, %v74_v35 }
  0x8d   :  { %v97_v62 = vsel %vm94_vm0, %v95_v52, %v176_v56  ;;  %v108_v63 = vsel %vm105_vm1, %v106_v53, %v178_v57  ;;  %vm116_vm2 = vcmp.lt.f32.partialorder %v115_v54, 0.5 }
  0x8e   :  { %v130_v2 = vsub.f32 %v128_v58, %v129_v59  ;;  %v141_v3 = vsub.f32 %v139_v60, %v140_v61  ;;  %v109_v4 = vadd.f32 %v108_v63, %v97_v62  ;;  %v152_v6 = vsub.f32 %v150_v48, %v151_v1 }
  0x8f   :  { %v119_v9 = vsel %vm116_vm2, %v117_v5, %v180_v0 }
  0x90   :  { %v131_v7 = vand.u32 2147483647, %v130_v2  ;;  %v142_v8 = vand.u32 2147483647, %v141_v3  ;;  %v153_v10 = vand.u32 2147483647, %v152_v6  ;;  %v133_v11 = vmul.f32 %v130_v2, %v130_v2 }
  0x91   :  { %v120_v14 = vadd.f32 %v119_v9, %v109_v4  ;;  %v144_v16 = vmul.f32 %v141_v3, %v141_v3  ;;  %v155_v20 = vmul.f32 %v152_v6, %v152_v6 }
  0x92   :  { %vm132_vm3 = vcmp.lt.f32.partialorder %v131_v7, 0.5  ;;  %v182_v12 = vadd.f32 -0.25, %v131_v7  ;;  %v184_v13 = vadd.f32 -0.25, %v142_v8  ;;  %vm143_vm4 = vcmp.lt.f32.partialorder %v142_v8, 0.5 }
  0x93   :  { %v186_v17 = vadd.f32 -0.25, %v153_v10  ;;  %vm154_vm5 = vcmp.lt.f32.partialorder %v153_v10, 0.5 }
  0x94   :  { %v135_v15 = vsel %vm132_vm3, %v133_v11, %v182_v12  ;;  %v146_v19 = vsel %vm143_vm4, %v144_v16, %v184_v13 }
  0x95   :  { %v136_v18 = vadd.f32 %v135_v15, %v120_v14  ;;  %v157_v22 = vsel %vm154_vm5, %v155_v20, %v186_v17 }
  0x97   :  { %v147_v21 = vadd.f32 %v146_v19, %v136_v18 }
  0x99   :  { %v158_v23 = vadd.f32 %v157_v22, %v147_v21 }
  0x9b   :  { %161 = vst.msk [vmem:[%s272_s3] sm:$0x3] %vm160_vm6, %v158_v23 }

</bundles_post_ra>
